<compile_context>
chip_gen: v7x
topology: tpu7x:2x2x1
jax: 0.10.0
libtpu: 0.0.40
codegen_flags: <defaults>
</compile_context>

<pallas_src>
import functools

import jax
import jax.numpy as jnp
from jax.experimental import pallas as pl
from jax.experimental.pallas import tpu as pltpu


def _round_up(v, m):
    return ((v + m - 1) // m) * m


def _round_down(v, m):
    return (v // m) * m


def _logreg_kernel(x_ref, w_ref, b_ref, o_ref, acc_ref, *, tk, d_total, mask_tail):
    # x_ref: (TB, TK) VMEM (streamed), w_ref: (1, TK) VMEM (resident-ish),
    # b_ref: (1,) SMEM scalar, o_ref: (TB, 1) VMEM, acc_ref: (TB, 1) f32 VMEM scratch.
    k = pl.program_id(1)

    @pl.when(k == 0)
    def _init():
        acc_ref[...] = jnp.zeros_like(acc_ref)

    x = x_ref[...]
    w = w_ref[...]                                   # broadcasts over the TB rows
    # Multiply in the native dtype (bf16-capable VPUs on v6e/v7x), accumulate in f32.
    prod = (x * w).astype(jnp.float32)
    if mask_tail:
        # Ragged feature tail: zero out columns beyond D in the last K block so
        # garbage in the partially-fetched x / w blocks never reaches the sum.
        col = jax.lax.broadcasted_iota(jnp.int32, prod.shape, dimension=1)
        prod = jnp.where(k * tk + col < d_total, prod, 0.0)
    acc_ref[...] += jnp.sum(prod, axis=-1, keepdims=True)

    @pl.when(k == pl.num_programs(1) - 1)
    def _finalize():
        logits = acc_ref[...] + b_ref[0]
        o_ref[...] = jax.nn.sigmoid(logits).astype(o_ref.dtype)


def _scoped_vmem_limit():
    """Generation-aware scoped VMEM limit (bytes)."""
    try:
        phys = pltpu.get_tpu_info().vmem_capacity_bytes
    except Exception:
        phys = 64 << 20                              # conservative fallback (v7x-sized)
    if phys >= (128 << 20):                          # v5e / v6e (128 MiB physical)
        return 32 << 20
    return min(phys // 2, 30 << 20)                  # v7x: stay well under 64 MiB/TC


def _choose_tiles(B, D, x_itemsize, out_itemsize, vmem_limit):
    """Pick (tb, tk) batch/feature tiles from a lane-padded VMEM byte budget."""
    LANE, SUB = 128, 8
    d_pad = _round_up(D, LANE)
    budget = max(vmem_limit - (2 << 20), 4 << 20)    # reserve for w / compiler scratch
    x_tile_cap = 8 << 20                             # ~8 MiB streamed x tile sweet spot

    def per_row_bytes(tk_pad):
        # double-buffered x rows + f32 product working set
        # + double-buffered lane-padded out rows + f32 accumulator rows
        return (2 * tk_pad * x_itemsize + tk_pad * 4
                + 2 * LANE * out_itemsize + LANE * 4)

    # Desired batch tile: guarantee >=2 grid programs when there is enough work
    # so the "parallel" batch axis can shard across both v7x TensorCores.
    if B > 2 * SUB:
        tb_want = _round_up(-(-B // 2), SUB)
    elif B >= SUB:
        tb_want = _round_down(B, SUB)
    else:
        tb_want = B                                  # tiny batch: full-extent block

    # 1) Single K block (full feature dim per tile) if the budget allows a deep tile.
    tb_fit = min(budget // per_row_bytes(d_pad),
                 max(x_tile_cap // (d_pad * x_itemsize), 1))
    tb_fit = _round_down(tb_fit, SUB)
    if tb_fit >= max(SUB, min(tb_want, 512)):
        return min(tb_want, tb_fit), D

    # 2) Wide-D: split the feature axis (tk multiple of 128) so the batch tile
    #    stays large instead of collapsing toward 8 rows.
    tb_max = _round_down(budget // per_row_bytes(LANE), SUB)
    tb = max(SUB, min(tb_want, tb_max)) if B >= SUB else B
    fixed = 2 * LANE * out_itemsize + LANE * 4
    tk_pad = (budget // max(tb, 1) - fixed) // (2 * x_itemsize + 4)
    tk_pad = max(LANE, _round_down(tk_pad, LANE))
    if tk_pad >= d_pad:
        return tb, D
    return tb, int(tk_pad)


def logistic_regression(x, w, b):
    """sigmoid(x @ w + b).  x: (B, D); w: (D, 1), (1, D) or (D,); b: (1,).  Returns (B, 1)."""
    B, D = x.shape
    w_row = jnp.asarray(w).reshape(1, D)             # row layout for the VPU reduce
    b1 = jnp.asarray(b).reshape(1).astype(jnp.float32)

    vmem_limit = _scoped_vmem_limit()
    out_dtype = x.dtype
    tb, tk = _choose_tiles(B, D, x.dtype.itemsize, jnp.dtype(out_dtype).itemsize,
                           vmem_limit)
    nb = pl.cdiv(B, tb)
    nk = pl.cdiv(D, tk)
    mask_tail = (nk > 1) and (D % tk != 0)

    kernel = functools.partial(_logreg_kernel, tk=tk, d_total=D, mask_tail=mask_tail)

    cost = pl.CostEstimate(
        flops=2 * B * D,
        transcendentals=B,
        bytes_accessed=B * D * x.dtype.itemsize
                       + D * w_row.dtype.itemsize
                       + B * jnp.dtype(out_dtype).itemsize,
    )

    return pl.pallas_call(
        kernel,
        out_shape=jax.ShapeDtypeStruct((B, 1), out_dtype),
        grid=(nb, nk),                                # reduction (K) axis last
        in_specs=[
            pl.BlockSpec((tb, tk), lambda i, k: (i, k)),            # streamed x tiles
            pl.BlockSpec((1, tk), lambda i, k: (0, k)),             # weight row slices
            pl.BlockSpec(memory_space=pltpu.MemorySpace.SMEM),      # scalar bias
        ],
        out_specs=pl.BlockSpec((tb, 1), lambda i, k: (i, 0)),
        scratch_shapes=[pltpu.VMEM((tb, 1), jnp.float32)],          # f32 accumulator
        compiler_params=pltpu.CompilerParams(
            dimension_semantics=("parallel", "arbitrary"),
            vmem_limit_bytes=vmem_limit,
        ),
        cost_estimate=cost,
    )(x, w_row, b1)


if __name__ == "__main__":
    key = jax.random.PRNGKey(0)
    kx, kw, kb = jax.random.split(key, 3)

    batch, input_dims = 8, 32

    x = jax.random.normal(kx, (batch, input_dims), dtype=jnp.float32)
    # Deterministic init mimicking nn.Linear(input_dims, 1): U(-1/sqrt(D), 1/sqrt(D))
    bound = 1.0 / (input_dims ** 0.5)
    w = jax.random.uniform(kw, (input_dims, 1), dtype=jnp.float32,
                           minval=-bound, maxval=bound)
    b = jax.random.uniform(kb, (1,), dtype=jnp.float32,
                           minval=-bound, maxval=bound)

    out = logistic_regression(x, w, b)
    out = jax.block_until_ready(out)

    # Reference check in plain JAX
    ref = jax.nn.sigmoid(x @ w + b.reshape(1, 1))
    assert out.shape == (batch, 1)
    assert jnp.allclose(out, ref, atol=1e-5, rtol=1e-5)

    print("KERNEL_OK")
</pallas_src>

<mosaic_0001>
module attributes {stable_mosaic.version = 11 : i64} {
  func.func @_logreg_kernel(%arg0: i32, %arg1: i32, %arg2: memref<8x32xf32, #tpu.memory_space<vmem>>, %arg3: memref<1x32xf32, #tpu.memory_space<vmem>>, %arg4: memref<1xf32, #tpu.memory_space<smem>>, %arg5: memref<8x1xf32, #tpu.memory_space<vmem>>, %arg6: memref<8x1xf32, #tpu.memory_space<vmem>>) attributes {dimension_semantics = [#tpu.dimension_semantics<parallel>, #tpu.dimension_semantics<arbitrary>], iteration_bounds = array<i64: 1, 1>, scalar_prefetch = 0 : i64, scratch_operands = 1 : i64, tpu.core_type = #tpu.core_type<tc>, window_params = [{transform_indices = @transform_0, window_bounds = array<i64: 8, 32>}, {transform_indices = @transform_1, window_bounds = array<i64: 1, 32>}, {transform_indices = @transform_2, window_bounds = array<i64: 1>}, {transform_indices = @transform_3, window_bounds = array<i64: 8, 1>}]} {
    %c0_i32 = arith.constant 0 : i32
    %0 = arith.cmpi eq, %arg1, %c0_i32 : i32
    %1 = arith.extui %0 : i1 to i32
    %c0_i32_0 = arith.constant 0 : i32
    %2 = arith.cmpi ne, %1, %c0_i32_0 : i32
    scf.if %2 {
      %cst_10 = arith.constant 0.000000e+00 : f32
      %15 = vector.broadcast %cst_10 : f32 to vector<8x1xf32>
      %c0_11 = arith.constant 0 : index
      %c0_12 = arith.constant 0 : index
      %16 = vector.load %arg6[%c0_11, %c0_12] : memref<8x1xf32, #tpu.memory_space<vmem>>, vector<8x1xf32>
      tpu.vector_store %arg6[%c0_11, %c0_12], %15 {strides = array<i32>} : memref<8x1xf32, #tpu.memory_space<vmem>>, vector<8x1xf32>,
    } else {
    }
    %c0 = arith.constant 0 : index
    %c0_1 = arith.constant 0 : index
    %3 = vector.load %arg2[%c0, %c0_1] : memref<8x32xf32, #tpu.memory_space<vmem>>, vector<8x32xf32>
    %c0_2 = arith.constant 0 : index
    %c0_3 = arith.constant 0 : index
    %4 = vector.load %arg3[%c0_2, %c0_3] : memref<1x32xf32, #tpu.memory_space<vmem>>, vector<1x32xf32>
    %5 = vector.broadcast %4 : vector<1x32xf32> to vector<8x32xf32>
    %6 = arith.mulf %3, %5 : vector<8x32xf32>
    %c0_4 = arith.constant 0 : index
    %c0_5 = arith.constant 0 : index
    %7 = vector.load %arg6[%c0_4, %c0_5] : memref<8x1xf32, #tpu.memory_space<vmem>>, vector<8x1xf32>
    %cst = arith.constant dense<0.000000e+00> : vector<8xf32>
    %8 = vector.multi_reduction <add>, %6, %cst [1] : vector<8x32xf32> to vector<8xf32>
    %9 = vector.shape_cast %8 : vector<8xf32> to vector<8x1xf32>
    %10 = arith.addf %7, %9 : vector<8x1xf32>
    %c0_6 = arith.constant 0 : index
    %c0_7 = arith.constant 0 : index
    %11 = vector.load %arg6[%c0_6, %c0_7] : memref<8x1xf32, #tpu.memory_space<vmem>>, vector<8x1xf32>
    tpu.vector_store %arg6[%c0_6, %c0_7], %10 {strides = array<i32>} : memref<8x1xf32, #tpu.memory_space<vmem>>, vector<8x1xf32>,
    %c0_i32_8 = arith.constant 0 : i32
    %12 = arith.cmpi eq, %arg1, %c0_i32_8 : i32
    %13 = arith.extui %12 : i1 to i32
    %c0_i32_9 = arith.constant 0 : i32
    %14 = arith.cmpi ne, %13, %c0_i32_9 : i32
    scf.if %14 {
      %c0_10 = arith.constant 0 : index
      %c0_11 = arith.constant 0 : index
      %15 = vector.load %arg6[%c0_10, %c0_11] : memref<8x1xf32, #tpu.memory_space<vmem>>, vector<8x1xf32>
      %c0_12 = arith.constant 0 : index
      %16 = memref.load %arg4[%c0_12] : memref<1xf32, #tpu.memory_space<smem>>
      %17 = vector.broadcast %16 : f32 to vector<8x1xf32>
      %18 = arith.addf %15, %17 : vector<8x1xf32>
      %19 = arith.negf %18 : vector<8x1xf32>
      %20 = math.exp %19 : vector<8x1xf32>
      %cst_13 = arith.constant 1.000000e+00 : f32
      %21 = vector.broadcast %cst_13 : f32 to vector<8x1xf32>
      %22 = arith.addf %21, %20 : vector<8x1xf32>
      %23 = arith.divf %21, %22 : vector<8x1xf32>
      %c0_14 = arith.constant 0 : index
      %c0_15 = arith.constant 0 : index
      %24 = vector.load %arg5[%c0_14, %c0_15] : memref<8x1xf32, #tpu.memory_space<vmem>>, vector<8x1xf32>
      tpu.vector_store %arg5[%c0_14, %c0_15], %23 {strides = array<i32>} : memref<8x1xf32, #tpu.memory_space<vmem>>, vector<8x1xf32>,
    } else {
    }
    return
  }
  func.func @transform_0(%arg0: i32, %arg1: i32) -> (i32, i32) {
    %c0_i32 = arith.constant 0 : i32
    return %arg0, %arg1 : i32, i32
  }
  func.func @transform_1(%arg0: i32, %arg1: i32) -> (i32, i32) {
    %c0_i32 = arith.constant 0 : i32
    %c0_i32_0 = arith.constant 0 : i32
    return %c0_i32, %arg1 : i32, i32
  }
  func.func @transform_2(%arg0: i32, %arg1: i32) -> i32 {
    %c0_i32 = arith.constant 0 : i32
    %c0_i32_0 = arith.constant 0 : i32
    return %c0_i32 : i32
  }
  func.func @transform_3(%arg0: i32, %arg1: i32) -> (i32, i32) {
    %c0_i32 = arith.constant 0 : i32
    %c0_i32_0 = arith.constant 0 : i32
    return %arg0, %c0_i32 : i32, i32
  }
}

</mosaic_0001>

<bundles_post_ra>
// kernel: tpu_custom_call.1
= control target key start
LH: loop header
LB: loop body
LE: loop exit
PB: predicated region body
PF: predicated region fallthrough
CT: control target
= control target key end

     0   :  { %9 = vsyncpa [#allocation5], 0  ;;  %s101_s12 = smov [#allocation4]   ;;  %s147_s0 = inlined_call_operand.hbm [shape: f32[8,32], index: 0, kind: input, shape index: {}]   ;;  %s148_s1 = inlined_call_operand.vmem [shape: f32[1,32], index: 1, kind: input, shape index: {}]   ;;  %s149_s2 = inlined_call_operand.<no memory space> [shape: f32[1], index: 2, kind: input, shape index: {}]   ;;  %s150_s3 = inlined_call_operand.vmem [shape: f32[8,1], index: 3, kind: output, shape index: {}]  }
   0x1   :  { %s16_s13 = sshll.u32 %s101_s12, 4  ;;  %s77_s16 = scalar_lea.hbm %s147_s0, 128  ;;  %s17_s13 = int_to_ptr.vmem [resolvable:$true] %s16_s13 }
   0x2   :  { %p78_p0 = scmp.ne.s32.totalorder %s147_s0, %s77_s16  ;;  %p81_p1 = scmp.lt.u32.totalorder %s77_s16, %s147_s0 }
   0x4   :  { %p83_p2 = pnand %p81_p1, %p78_p0 }
   0x6   :  { %86 = shalt.err (!%p83_p2)
}
   0x7   :  { %s87_s21 = scalar_lea.vmem %s17_s13, 128  ;;  %p92_p4 = scmp.lt.s32.totalorder %s17_s13, %s17_s13 }
   0x8   :  { %p88_p3 = scmp.ne.s32.totalorder %s17_s13, %s87_s21  ;;  %p93_p5 = scmp.lt.s32.totalorder %s87_s21, %s87_s21 }
   0xa   :  { %p94_p6 = por %p93_p5, %p92_p4 }
   0xc   :  { %p95_p7 = pnand %p94_p6, %p88_p3 }
   0xe   :  { %98 = shalt.err (!%p95_p7)
}
   0xf   :  { %19 = dma.hbm_to_vmem [thread:$0]  %s147_s0, 128, %s17_s13, [#allocation5]  }
  0x10   :  { %99 = dma.done.wait [#allocation5], 128  }
  0x11   :  { %100 = vsyncadd [#allocation5], 4294967168  ;;  %vm31_vm0 = vcmask 7168   ;;  %v102_v0 = vmov 0.0   ;;  %v33_v1 = vld [vmem:[#allocation4] sm:$0xff]  ;;  %vm43_vm1 = vcmask 261120   ;;  %v55_v8 = vstv %s149_s2 }
  0x12   :  { %32 = vst.msk [vmem:[#allocation2] sm:$0xff] %vm31_vm0, %v102_v0  ;;  %v69_v2 = vld [vmem:[%s148_s1] ss:$0 sm:$0xff] }
  0x13   :  { %v41_v3 = vmul.f32 %v69_v2, %v33_v1 }
  0x15   :  { %v44_v4 = vsel %vm43_vm1, %v41_v3, 0.0 }
  0x16   :  { %45 = vadd.xlane.f32.xlu0 %v44_v4 }
  0x19   :  { %v42_v5 = vld [vmem:[#allocation2] sm:$0xff] }
  0xa3   :  { %v46_v6 = vpop.xlane.xlu0 %45 }
  0xa4   :  { %v47_v7 = vadd.f32 %v46_v6, %v42_v5 }
  0xa6   :  { %49 = vst.msk [vmem:[#allocation2] sm:$0xff] %vm31_vm0, %v47_v7 }
  0xad   :  { %v53_v9 = vld [vmem:[#allocation2] sm:$0xff] }
  0xae   :  { %v56_v10 = vadd.f32 %v55_v8, %v53_v9 }
  0xb0   :  { %v70_v11 = vmul.f32 -1.442695, %v56_v10 }
  0xb2   :  { %73 = vpow2.f32 %v70_v11 }
  0xbc   :  { %v74_v12 = vpop.eup %73 }
  0xbd   :  { %v60_v13 = vadd.f32 1.0, %v74_v12 }
  0xbf   :  { %75 = vrcp.f32 %v60_v13 }
  0xc9   :  { %v76_v14 = vpop.eup %75 }
  0xca   :  { %63 = vst.msk [vmem:[%s150_s3] sm:$0xff] %vm31_vm0, %v76_v14 }
  0xcb   :  { %68 = vsyncpa [#allocation5], 1 }

</bundles_post_ra>
